<compile_context>
chip_gen: v7x
topology: tpu7x:2x2x1
jax: 0.10.0
libtpu: 0.0.40
codegen_flags: <defaults>
</compile_context>

<pallas_src>
import jax
import jax.numpy as jnp
from jax.experimental import pallas as pl
from jax.experimental.pallas import tpu as pltpu


def _round_up(x, m):
    return (x + m - 1) // m * m


def _mlp_head_kernel(x_ref, w1_ref, b1_ref, w2_ref, b2_ref, out_ref, acc_ref):
    # x_ref:   (tm, tk)  bf16   ROI-feature tile
    # w1_ref:  (tk, Hp)  bf16   fc1 weight slab (streamed over k)
    # b1_ref:  (1, Hp)   f32    resident
    # w2_ref:  (Hp, Hp)  bf16   resident
    # b2_ref:  (1, Hp)   f32    resident
    # out_ref: (tm, Hp)  f32
    # acc_ref: (tm, Hp)  f32    VMEM scratch accumulator
    k = pl.program_id(1)
    nk = pl.num_programs(1)

    @pl.when(k == 0)
    def _():
        # Fold fc1 bias into the accumulator init (no epilogue add needed).
        acc_ref[...] = jnp.broadcast_to(b1_ref[...], acc_ref.shape)

    acc_ref[...] += jnp.dot(x_ref[...], w1_ref[...],
                            preferred_element_type=jnp.float32)

    @pl.when(k == nk - 1)
    def _():
        h = jnp.maximum(acc_ref[...], 0.0).astype(w2_ref.dtype)   # relu(fc1), bf16 for MXU
        y = jnp.dot(h, w2_ref[...],
                    preferred_element_type=jnp.float32) + b2_ref[...]
        out_ref[...] = jnp.maximum(y, 0.0).astype(out_ref.dtype)  # relu(fc2)


def prepare_roi_2mlp_params(w1, b1, w2, b2):
    """One-time (load-time) parameter prep.

    w1: (H, D_in) PyTorch-layout fc1 weight, b1: (H,)
    w2: (H, H)    PyTorch-layout fc2 weight, b2: (H,)

    Transposes to (in, out) for y = x @ W, casts matmul operands to bf16,
    and zero-pads lane dims to multiples of 128 (so real Fast R-CNN configs
    are untouched and toy configs still get unmasked stores).
    """
    hidden, d_in = w1.shape
    hp = _round_up(hidden, 128)
    dk128 = _round_up(d_in, 128)
    tk = min(1024, dk128)                 # fc1 reduction tile (bf16; fits v7x budget)
    dp = _round_up(dk128, tk)

    w1_t = jnp.pad(jnp.transpose(w1).astype(jnp.bfloat16),
                   ((0, dp - d_in), (0, hp - hidden)))            # (Dp, Hp)
    w2_t = jnp.pad(jnp.transpose(w2).astype(jnp.bfloat16),
                   ((0, hp - hidden), (0, hp - hidden)))          # (Hp, Hp)
    b1_p = jnp.pad(b1.astype(jnp.float32), (0, hp - hidden)).reshape(1, hp)
    b2_p = jnp.pad(b2.astype(jnp.float32), (0, hp - hidden)).reshape(1, hp)

    return {"w1": w1_t, "b1": b1_p, "w2": w2_t, "b2": b2_p,
            "d_in": d_in, "hidden": hidden, "tk": tk}


def roi_2mlp_head_forward(x_pooled, params):
    """x_pooled: (N, C, R, R) pooled ROI features (output of roi_xform).
    params: result of prepare_roi_2mlp_params.
    Returns: (N, H) float32 = relu(fc2(relu(fc1(x.view(N, -1)))))."""
    n = x_pooled.shape[0]
    d_in = params["d_in"]
    hidden = params["hidden"]
    tk = params["tk"]
    w1, b1, w2, b2 = params["w1"], params["b1"], params["w2"], params["b2"]
    dp, hp = w1.shape

    # Matches PyTorch's x.view(batch, -1) (NCHW, row-major).
    x_flat = x_pooled.reshape(n, -1).astype(jnp.bfloat16)
    assert x_flat.shape[1] == d_in

    # Row tile: up to 256 ROIs per step (multiple of 8 sublanes).
    nm = _round_up(n, 8)
    tm = min(256, nm)
    n_pad = _round_up(nm, tm)
    x_p = jnp.pad(x_flat, ((0, n_pad - n), (0, dp - d_in)))       # (Np, Dp) bf16

    grid = (n_pad // tm, dp // tk)

    flops = 2 * n_pad * dp * hp + 2 * n_pad * hp * hp
    bytes_accessed = (x_p.size * 2 + w1.size * 2 + w2.size * 2
                      + b1.size * 4 + b2.size * 4 + n_pad * hp * 4)

    out = pl.pallas_call(
        _mlp_head_kernel,
        out_shape=jax.ShapeDtypeStruct((n_pad, hp), jnp.float32),
        grid=grid,
        in_specs=[
            pl.BlockSpec((tm, tk), lambda i, k: (i, k)),   # x tile
            pl.BlockSpec((tk, hp), lambda i, k: (k, 0)),   # fc1 weight slab
            pl.BlockSpec((1, hp), lambda i, k: (0, 0)),    # b1 (resident)
            pl.BlockSpec((hp, hp), lambda i, k: (0, 0)),   # fc2 weight (resident)
            pl.BlockSpec((1, hp), lambda i, k: (0, 0)),    # b2 (resident)
        ],
        out_specs=pl.BlockSpec((tm, hp), lambda i, k: (i, 0)),
        scratch_shapes=[pltpu.VMEM((tm, hp), jnp.float32)],
        compiler_params=pltpu.CompilerParams(
            dimension_semantics=("parallel", "arbitrary"),
            # ~13 MB worst-case footprint at realistic shapes; 48 MiB leaves
            # headroom and stays under v7x's 64 MiB physical VMEM.
            vmem_limit_bytes=48 * 1024 * 1024),
        cost_estimate=pl.CostEstimate(flops=flops, transcendentals=0,
                                      bytes_accessed=bytes_accessed),
    )(x_p, w1, b1, w2, b2)

    return out[:n, :hidden]


def _xavier_fill(key, shape):
    # Caffe2 XavierFill: uniform(-s, s), s = sqrt(3 / fan_in), fan_in = shape[1]
    fan_in = shape[1]
    scale = jnp.sqrt(3.0 / fan_in)
    return jax.random.uniform(key, shape, jnp.float32, minval=-scale, maxval=scale)


if __name__ == "__main__":
    # Small synthetic config (stand-ins for cfg.FAST_RCNN.*).  Chosen so the
    # kernel exercises row padding, lane padding, AND a multi-step fc1
    # reduction (D_in = 32*7*7 = 1568 > tk after padding -> 2 K-steps).
    dim_in = 32
    roi_size = 7
    hidden_dim = 96
    num_rois = 10
    d_in = dim_in * roi_size ** 2  # 1568

    key = jax.random.PRNGKey(0)
    kx, k1, k2 = jax.random.split(key, 3)

    # TODO(synk): roi_xform (ROIAlign over rpn_ret['rois']) is an external
    # callable; the kernel consumes the pooled features it would produce.
    x_pooled = jax.random.normal(kx, (num_rois, dim_in, roi_size, roi_size),
                                 jnp.float32)

    # Deterministic parameter init (XavierFill weights, zero biases).
    w1 = _xavier_fill(k1, (hidden_dim, d_in))
    b1 = jnp.zeros((hidden_dim,), jnp.float32)
    w2 = _xavier_fill(k2, (hidden_dim, hidden_dim))
    b2 = jnp.zeros((hidden_dim,), jnp.float32)

    params = prepare_roi_2mlp_params(w1, b1, w2, b2)   # one-time, load-time prep
    out = roi_2mlp_head_forward(x_pooled, params)
    out = jax.block_until_ready(out)

    # Reference check in plain JAX f32 (same semantics as the PyTorch forward).
    # Kernel uses bf16 matmul operands with f32 accumulation -> relaxed tol.
    x_flat = x_pooled.reshape(num_rois, -1)
    ref = jnp.maximum(x_flat @ w1.T + b1, 0.0)
    ref = jnp.maximum(ref @ w2.T + b2, 0.0)
    assert out.shape == (num_rois, hidden_dim)
    assert jnp.allclose(out, ref, atol=5e-2, rtol=5e-2), (
        float(jnp.max(jnp.abs(out - ref))))

    print("KERNEL_OK")
</pallas_src>

<mosaic_0001>
module attributes {stable_mosaic.version = 11 : i64} {
  func.func @_mlp_head_kernel(%arg0: i32, %arg1: i32, %arg2: memref<16x1024xbf16, #tpu.memory_space<vmem>>, %arg3: memref<1024x128xbf16, #tpu.memory_space<vmem>>, %arg4: memref<1x128xf32, #tpu.memory_space<vmem>>, %arg5: memref<128x128xbf16, #tpu.memory_space<vmem>>, %arg6: memref<1x128xf32, #tpu.memory_space<vmem>>, %arg7: memref<16x128xf32, #tpu.memory_space<vmem>>, %arg8: memref<16x128xf32, #tpu.memory_space<vmem>>) attributes {dimension_semantics = [#tpu.dimension_semantics<parallel>, #tpu.dimension_semantics<arbitrary>], iteration_bounds = array<i64: 1, 2>, scalar_prefetch = 0 : i64, scratch_operands = 1 : i64, tpu.core_type = #tpu.core_type<tc>, window_params = [{transform_indices = @transform_0, window_bounds = array<i64: 16, 1024>}, {transform_indices = @transform_1, window_bounds = array<i64: 1024, 128>}, {pipeline_mode = #tpu.pipeline_mode<synchronous>, transform_indices = @transform_2, window_bounds = array<i64: 1, 128>}, {pipeline_mode = #tpu.pipeline_mode<synchronous>, transform_indices = @transform_3, window_bounds = array<i64: 128, 128>}, {pipeline_mode = #tpu.pipeline_mode<synchronous>, transform_indices = @transform_4, window_bounds = array<i64: 1, 128>}, {transform_indices = @transform_5, window_bounds = array<i64: 16, 128>}]} {
    %c0_i32 = arith.constant 0 : i32
    %0 = arith.cmpi eq, %arg1, %c0_i32 : i32
    %1 = arith.extui %0 : i1 to i32
    %c0_i32_0 = arith.constant 0 : i32
    %2 = arith.cmpi ne, %1, %c0_i32_0 : i32
    scf.if %2 {
      %c0_9 = arith.constant 0 : index
      %c0_10 = arith.constant 0 : index
      %12 = vector.load %arg4[%c0_9, %c0_10] : memref<1x128xf32, #tpu.memory_space<vmem>>, vector<1x128xf32>
      %13 = vector.shape_cast %12 : vector<1x128xf32> to vector<1x128xf32>
      %14 = vector.broadcast %13 : vector<1x128xf32> to vector<16x128xf32>
      %c0_11 = arith.constant 0 : index
      %c0_12 = arith.constant 0 : index
      %15 = vector.load %arg8[%c0_11, %c0_12] : memref<16x128xf32, #tpu.memory_space<vmem>>, vector<16x128xf32>
      tpu.vector_store %arg8[%c0_11, %c0_12], %14 {strides = array<i32>} : memref<16x128xf32, #tpu.memory_space<vmem>>, vector<16x128xf32>,
    } else {
    }
    %c0 = arith.constant 0 : index
    %c0_1 = arith.constant 0 : index
    %3 = vector.load %arg8[%c0, %c0_1] : memref<16x128xf32, #tpu.memory_space<vmem>>, vector<16x128xf32>
    %c0_2 = arith.constant 0 : index
    %c0_3 = arith.constant 0 : index
    %4 = vector.load %arg2[%c0_2, %c0_3] : memref<16x1024xbf16, #tpu.memory_space<vmem>>, vector<16x1024xbf16>
    %c0_4 = arith.constant 0 : index
    %c0_5 = arith.constant 0 : index
    %5 = vector.load %arg3[%c0_4, %c0_5] : memref<1024x128xbf16, #tpu.memory_space<vmem>>, vector<1024x128xbf16>
    %cst = arith.constant dense<0.000000e+00> : vector<16x128xf32>
    %6 = tpu.matmul %4, %5, %cst {dimension_numbers = #tpu.dot_dimension_numbers<[1], [0], [0], [1], [0, 0, 1, 1], [], []>} : vector<16x1024xbf16>, vector<1024x128xbf16>, vector<16x128xf32> -> vector<16x128xf32>
    %7 = arith.addf %3, %6 : vector<16x128xf32>
    %c0_6 = arith.constant 0 : index
    %c0_7 = arith.constant 0 : index
    %8 = vector.load %arg8[%c0_6, %c0_7] : memref<16x128xf32, #tpu.memory_space<vmem>>, vector<16x128xf32>
    tpu.vector_store %arg8[%c0_6, %c0_7], %7 {strides = array<i32>} : memref<16x128xf32, #tpu.memory_space<vmem>>, vector<16x128xf32>,
    %c1_i32 = arith.constant 1 : i32
    %9 = arith.cmpi eq, %arg1, %c1_i32 : i32
    %10 = arith.extui %9 : i1 to i32
    %c0_i32_8 = arith.constant 0 : i32
    %11 = arith.cmpi ne, %10, %c0_i32_8 : i32
    scf.if %11 {
      %c0_9 = arith.constant 0 : index
      %c0_10 = arith.constant 0 : index
      %12 = vector.load %arg8[%c0_9, %c0_10] : memref<16x128xf32, #tpu.memory_space<vmem>>, vector<16x128xf32>
      %cst_11 = arith.constant 0.000000e+00 : f32
      %13 = vector.broadcast %cst_11 : f32 to vector<16x128xf32>
      %14 = arith.maximumf %12, %13 : vector<16x128xf32>
      %15 = arith.truncf %14 : vector<16x128xf32> to vector<16x128xbf16>
      %c0_12 = arith.constant 0 : index
      %c0_13 = arith.constant 0 : index
      %16 = vector.load %arg5[%c0_12, %c0_13] : memref<128x128xbf16, #tpu.memory_space<vmem>>, vector<128x128xbf16>
      %cst_14 = arith.constant dense<0.000000e+00> : vector<16x128xf32>
      %17 = tpu.matmul %15, %16, %cst_14 {dimension_numbers = #tpu.dot_dimension_numbers<[1], [0], [0], [1], [0, 0, 1, 1], [], []>} : vector<16x128xbf16>, vector<128x128xbf16>, vector<16x128xf32> -> vector<16x128xf32>
      %c0_15 = arith.constant 0 : index
      %c0_16 = arith.constant 0 : index
      %18 = vector.load %arg6[%c0_15, %c0_16] : memref<1x128xf32, #tpu.memory_space<vmem>>, vector<1x128xf32>
      %19 = vector.broadcast %18 : vector<1x128xf32> to vector<16x128xf32>
      %20 = arith.addf %17, %19 : vector<16x128xf32>
      %cst_17 = arith.constant 0.000000e+00 : f32
      %21 = vector.broadcast %cst_17 : f32 to vector<16x128xf32>
      %22 = arith.maximumf %20, %21 : vector<16x128xf32>
      %c0_18 = arith.constant 0 : index
      %c0_19 = arith.constant 0 : index
      %23 = vector.load %arg7[%c0_18, %c0_19] : memref<16x128xf32, #tpu.memory_space<vmem>>, vector<16x128xf32>
      tpu.vector_store %arg7[%c0_18, %c0_19], %22 {strides = array<i32>} : memref<16x128xf32, #tpu.memory_space<vmem>>, vector<16x128xf32>,
    } else {
    }
    return
  }
  func.func @transform_0(%arg0: i32, %arg1: i32) -> (i32, i32) {
    %c0_i32 = arith.constant 0 : i32
    return %arg0, %arg1 : i32, i32
  }
  func.func @transform_1(%arg0: i32, %arg1: i32) -> (i32, i32) {
    %c0_i32 = arith.constant 0 : i32
    %c0_i32_0 = arith.constant 0 : i32
    return %arg1, %c0_i32 : i32, i32
  }
  func.func @transform_2(%arg0: i32, %arg1: i32) -> (i32, i32) {
    %c0_i32 = arith.constant 0 : i32
    %c0_i32_0 = arith.constant 0 : i32
    %c0_i32_1 = arith.constant 0 : i32
    return %c0_i32, %c0_i32_0 : i32, i32
  }
  func.func @transform_3(%arg0: i32, %arg1: i32) -> (i32, i32) {
    %c0_i32 = arith.constant 0 : i32
    %c0_i32_0 = arith.constant 0 : i32
    %c0_i32_1 = arith.constant 0 : i32
    return %c0_i32, %c0_i32_0 : i32, i32
  }
  func.func @transform_4(%arg0: i32, %arg1: i32) -> (i32, i32) {
    %c0_i32 = arith.constant 0 : i32
    %c0_i32_0 = arith.constant 0 : i32
    %c0_i32_1 = arith.constant 0 : i32
    return %c0_i32, %c0_i32_0 : i32, i32
  }
  func.func @transform_5(%arg0: i32, %arg1: i32) -> (i32, i32) {
    %c0_i32 = arith.constant 0 : i32
    %c0_i32_0 = arith.constant 0 : i32
    return %arg0, %c0_i32 : i32, i32
  }
}

</mosaic_0001>

<bundles_post_ra>
// kernel: tpu_custom_call.1
= control target key start
LH: loop header
LB: loop body
LE: loop exit
PB: predicated region body
PF: predicated region fallthrough
CT: control target
= control target key end

     0   :  { %s2202_s0 = inlined_call_operand.hbm [shape: bf16[16,2048], index: 0, kind: input, shape index: {}]   ;;  %s2203_s1 = inlined_call_operand.hbm [shape: bf16[2048,128], index: 1, kind: input, shape index: {}]   ;;  %s2204_s2 = inlined_call_operand.vmem [shape: f32[1,128], index: 2, kind: input, shape index: {}]   ;;  %s2205_s3 = inlined_call_operand.hbm [shape: bf16[128,128], index: 3, kind: input, shape index: {}]   ;;  %s2206_s4 = inlined_call_operand.vmem [shape: f32[1,128], index: 4, kind: input, shape index: {}]   ;;  %s2207_s5 = inlined_call_operand.hbm [shape: f32[16,128], index: 5, kind: output, shape index: {}]  }
   0x1   :  { %2215 = sst [smem:[#allocation15_spill]] %s2202_s0 }
   0x2   :  { %2216 = sst [smem:[#allocation16_spill]] %s2205_s3 }
   0x3   :  { %10 = vsyncpa [#allocation4], 0 }
   0x4   :  { %12 = vsyncpa [#allocation4 + $0x1], 0 }
   0x5   :  { %13 = vsyncpa [#allocation7], 0 }
   0x6   :  { %15 = vsyncpa [#allocation7 + $0x1], 0 }
   0x7   :  { %16 = vsyncpa [#allocation5], 0  ;;  %s1889_s18 = smov 0   ;;  %s1891_s19 = smov 0  }
   0x8   :  { %s1893_s20 = smov 0   ;;  %s1895_s21 = smov 0  }
   0x9   :  { %s1897_s22 = smov 0   ;;  %s1899_s23 = smov 0  }
   0xa LB: > { %s1918_s24 = sadd.s32 4294967295, %s1844_s23   ;;  %s43_s25 = sadd.s32 1, %s1832_s20  ;;  %s1844_s23 = sphi %s1899_s23, %s22_s23   ;;  %s1840_s22 = sphi %s1897_s22, %s2237_s22   ;;  %s1836_s21 = sphi %s1895_s21, %s2236_s21   ;;  %s1832_s20 = sphi %s1893_s20, %s2235_s20   ;;  %s1828_s19 = sphi %s1891_s19, %s2234_s19   ;;  %s1824_s18 = sphi %s1889_s18, %s2233_s18  }
   0xb   : > { %p50_p0 = scmp.ne.s32.totalorder %s1832_s20, %s1828_s19  ;;  %p51_p1 = scmp.eq.s32.totalorder %s1844_s23, 0 }
   0xc   : > { %p56_p2 = scmp.ne.s32.totalorder %s1828_s19, %s1824_s18  ;;  %p2208_p3 = scmp.eq.s32.totalorder %s1918_s24, 0 }
   0xd   : > { %p52_p4 = por %p51_p1, %p50_p0  ;;  %p1289_p5 = scmp.ge.s32.totalorder %s1844_s23, 1 }
   0xe   : > { %p1929_p6 = por %p2208_p3, %p56_p2  ;;  %p182_p7 = scmp.lt.s32.totalorder %s1844_s23, 3 }
   0xf   : > { %s1846_s28 = smov [#allocation8]   ;;  %p1533_p10 = scmp.lt.s32.totalorder %s1844_s23, 2 }
  0x10   : > { %s2217_s26 = scalar_select %p1929_p6, 1, 0 }
  0x11   : > { %p1934_p8 = pnand %p1289_p5, %p182_p7  ;;  %s197_s29 = sshll.u32 %s1846_s28, 4  ;;  %s198_s29 = int_to_ptr.vmem [resolvable:$true] %s197_s29 }
  0x12   : > { %p1947_p12 = pnand %p1533_p10, %p52_p4  ;;  %s31_s7 = sadd.s32 1, %s1840_s22 }
  0x13   : > { %s2218_s27 = scalar_select %p1934_p8, 1, 0 }
  0x14   : > { %p1521_p9 = pneg %p1934_p8  ;;  %s2221_s3 = sld [smem:[#allocation16_spill]] }
  0x15   : > { %s2220_s6 = scalar_select %p1947_p12, 1, 0 }
  0x16   : > { %p1943_p11 = pnand %p1521_p9, %p2208_p3 }
  0x18   : > { %p1670_p0 = pneg %p1943_p11 }
  0x1a   : > { %s1668_s10 = scalar_lea.hbm %s2221_s3, 1024 }
  0x1b   : > { %p1669_p13 = scmp.ne.s32.totalorder %s2221_s3, %s1668_s10  ;;  %p1675_p4 = scmp.lt.u32.totalorder %s1668_s10, %s2221_s3 }
  0x1d   : > { %p1671_p1 = pnand %p1670_p0, %p1669_p13 }
  0x1f   : > { %p1672_p2 = pneg %p1671_p1 }
  0x21   : > { %p1677_p5 = pnand %p1675_p4, %p1672_p2 }
  0x23   : > { %1680 = shalt.err (!%p1677_p5)
}
  0x24   : > { %s1681_s15 = scalar_lea.vmem %s198_s29, 1024  ;;  %p1689_p3 = scmp.lt.s32.totalorder %s198_s29, %s198_s29 }
  0x25   : > { %p1682_p7 = scmp.ne.s32.totalorder %s198_s29, %s1681_s15  ;;  %p1690_p6 = scmp.lt.s32.totalorder %s1681_s15, %s1681_s15 }
  0x27   : > { %p1684_p9 = pnand %p1682_p7, %p1670_p0  ;;  %p1691_p8 = por %p1690_p6, %p1689_p3 }
  0x29   : > { %p1685_p10 = pneg %p1684_p9 }
  0x2b   : > { %p1692_p12 = pnand %p1691_p8, %p1685_p10 }
  0x2d   : > { %1695 = shalt.err (!%p1692_p12)
}
  0x2e   : > { %s2212_s16 = smov 64   ;;  %s2213_s17 = smov 4  }
  0x2f   : > { %1524 = dma.hbm_to_vmem [thread:$0]  (!%p1943_p11), %s2221_s3, 1024, %s198_s29, [#allocation7], %s2212_s16, %s2212_s16, %s2213_s17  }
  0x30   : > { %p32_p3 = scmp.ge.s32.totalorder %s31_s7, 2  ;;  %s1972_s8 = sand.u32 1, %s1832_s20  }
  0x31   : > { %s1390_s9 = sshll.u32 %s1840_s22, 9  ;;  %s1292_s10 = sshll.u32 %s1972_s8, 6 }
  0x32   : > { %s2239_s7 = smov (%p32_p3, %s31_s7), 0  ;;  %s2223_s0 = sld [smem:[#allocation15_spill]] }
  0x33   : > { %2222 = sst [smem:[#allocation14_spill]] %s2239_s7  ;;  %s39_s30 = ssub.s32 %s1840_s22, %s2239_s7 }
  0x34   : > { %p41_p6 = scmp.eq.s32.totalorder %s39_s30, 0  ;;  %s218_s29 = scalar_lea.vmem [#allocation3], %s1292_s10 }
  0x35   : > { %s228_s14 = sshll.u32 %s218_s29, 4  ;;  %s215_s28 = scalar_lea.sflag [#allocation4], %s1972_s8  ;;  %s1990_s14 = int_to_ptr.vmem [resolvable:$true] %s228_s14 }
  0x36   : > { %s1988_s15 = scalar_select %p41_p6, %s1832_s20, %s43_s25  }
  0x37   : > { %p2224_p11 = scmp.ne.s32.totalorder %s2220_s6, 0 }
  0x38   : > { %s1983_s13 = scalar_lea.hbm %s2223_s0, %s1390_s9  ;;  %s1701_s10 = scalar_lea.hbm %s2223_s0, 2048 }
  0x39   : > { %s1696_s16 = scalar_lea.hbm %s1983_s13, 1024  ;;  %p1698_p12 = pneg %p2224_p11 }
  0x3a   : > { %p1697_p8 = scmp.ne.s32.totalorder %s1983_s13, %s1696_s16  ;;  %p1702_p1 = scmp.lt.u32.totalorder %s1983_s13, %s2223_s0 }
  0x3b   : > { %p1703_p2 = scmp.lt.u32.totalorder %s1701_s10, %s1696_s16  ;;  %p1705_p5 = scmp.lt.u32.totalorder %s1696_s16, %s1983_s13 }
  0x3c   : > { %p1699_p13 = pnand %p1698_p12, %p1697_p8 }
  0x3d   : > { %p1704_p4 = por %p1703_p2, %p1702_p1 }
  0x3e   : > { %p1700_p0 = pneg %p1699_p13 }
  0x3f   : > { %p1706_p7 = por %p1705_p5, %p1704_p4 }
  0x41   : > { %p1707_p9 = pnand %p1706_p7, %p1700_p0 }
  0x43   : > { %1710 = shalt.err (!%p1707_p9)
}
  0x44   : > { %s1711_s25 = scalar_lea.vmem %s1990_s14, 1024  ;;  %s1849_s29 = smov [#allocation3]  }
  0x45   : > { %p1712_p10 = scmp.ne.s32.totalorder %s1990_s14, %s1711_s25  ;;  %s1716_s9 = sshll.u32 %s1849_s29, 4  ;;  %s1717_s9 = int_to_ptr.vmem [resolvable:$false] %s1716_s9 }
  0x46   : > { %s1718_s30 = scalar_lea.vmem %s1717_s9, 2048  ;;  %p1719_p8 = scmp.lt.s32.totalorder %s1990_s14, %s1717_s9 }
  0x47   : > { %p1714_p3 = pnand %p1712_p10, %p1698_p12  ;;  %p1720_p13 = scmp.lt.s32.totalorder %s1718_s30, %s1711_s25 }
  0x49   : > { %p1715_p6 = pneg %p1714_p3  ;;  %p1721_p1 = por %p1720_p13, %p1719_p8 }
  0x4b   : > { %p1722_p2 = pnand %p1721_p1, %p1715_p6 }
  0x4d   : > { %1725 = shalt.err (!%p1722_p2)
}
  0x4e   : > { %s1850_s16 = smov 1024   ;;  %s1851_s10 = smov 512  }
  0x4f   : > { %s1852_s11 = smov 32   ;;  %s1295_s12 = sshll.u32 %s1972_s8, 9 }
  0x50   : > { %1528 = dma.hbm_to_vmem [thread:$0]  (!%p2224_p11), %s1983_s13, 1024, %s1990_s14, %s215_s28, %s1850_s16, %s1851_s10, %s1852_s11  }
  0x51   : > { %s1391_s29 = sshll.u32 %s1840_s22, 13  ;;  %s242_s17 = scalar_lea.vmem [#allocation6], %s1295_s12 }
  0x52   : > { %s2026_s30 = scalar_lea.hbm %s2203_s1, %s1391_s29  ;;  %s249_s18 = sshll.u32 %s242_s17, 4  ;;  %s2028_s18 = int_to_ptr.vmem [resolvable:$true] %s249_s18 }
  0x53   : > { %s2225_s0 = sand.u32 1, %s1844_s23   ;;  %s1726_s7 = scalar_lea.hbm %s2026_s30, 8192 }
  0x54   : > { %s2032_s3 = scalar_lea.sflag [#allocation7], %s2225_s0  ;;  %p1727_p0 = scmp.ne.s32.totalorder %s2026_s30, %s1726_s7 }
  0x55   : > { %s1731_s14 = scalar_lea.hbm %s2203_s1, 16384  ;;  %p1732_p7 = scmp.lt.u32.totalorder %s2026_s30, %s2203_s1 }
  0x56   : > { %p1729_p4 = pnand %p1727_p0, %p1698_p12  ;;  %p1733_p9 = scmp.lt.u32.totalorder %s1731_s14, %s1726_s7 }
  0x57   : > { %p1735_p3 = scmp.lt.u32.totalorder %s1726_s7, %s2026_s30 }
  0x58   : > { %p1730_p5 = pneg %p1729_p4  ;;  %p1734_p10 = por %p1733_p9, %p1732_p7 }
  0x5a   : > { %p1736_p6 = por %p1735_p3, %p1734_p10 }
  0x5c   : > { %p1737_p8 = pnand %p1736_p6, %p1730_p5 }
  0x5e   : > { %1740 = shalt.err (!%p1737_p8)
}
  0x5f   : > { %s1741_s0 = scalar_lea.vmem %s2028_s18, 8192  ;;  %s1853_s17 = smov [#allocation6]  }
  0x60   : > { %p1742_p13 = scmp.ne.s32.totalorder %s2028_s18, %s1741_s0  ;;  %s1746_s10 = sshll.u32 %s1853_s17, 4  ;;  %s1747_s10 = int_to_ptr.vmem [resolvable:$false] %s1746_s10 }
  0x61   : > { %s1748_s11 = scalar_lea.vmem %s1747_s10, 16384  ;;  %p1749_p0 = scmp.lt.s32.totalorder %s2028_s18, %s1747_s10 }
  0x62   : > { %p1744_p1 = pnand %p1742_p13, %p1698_p12  ;;  %p1750_p4 = scmp.lt.s32.totalorder %s1748_s11, %s1741_s0 }
  0x64   : > { %p1745_p2 = pneg %p1744_p1  ;;  %p1751_p7 = por %p1750_p4, %p1749_p0 }
  0x66   : > { %p1752_p9 = pnand %p1751_p7, %p1745_p2 }
  0x68   : > { %1755 = shalt.err (!%p1752_p9)
}
  0x69   : > { %s2226_s7 = smov 4   ;;  %s2227_s12 = smov 64  }
  0x6a   : > { %1531 = dma.hbm_to_vmem [thread:$0]  (!%p2224_p11), %s2026_s30, 8192, %s2028_s18, %s2032_s3, %s2227_s12, %s2227_s12, %s2226_s7  }
  0x6b   : > { %p2228_p12 = scmp.ne.s32.totalorder %s2218_s27, 0 }
  0x6c   : > { %s263_s29 = sand.u32 (!%p2228_p12), 1, %s1828_s19   ;;  %p2229_p5 = scmp.ne.s32.totalorder (!%p2228_p12), %s2217_s26, 0 }
  0x6d   : > { %261 = sbr.rel (%p2228_p12) target bundleno = 678 (0x2a6), region = 40  ;;  %s1299_s25 = sshll.u32 (!%p2228_p12), %s263_s29, 6 }
  0x6e   : > { %s264_s9 = scalar_lea.sflag (!%p2228_p12), [#allocation4], %s263_s29  ;;  %s2064_s8 = scalar_lea.vmem (!%p2228_p12), [#allocation3], %s1299_s25 }
  0x74   : > { %1807 = dma.done.wait (%p2229_p5), %s264_s9, 1024  }
  0x75   : > { %1809 = vsyncadd (%p2229_p5), %s264_s9, 4294966272  ;;  %s272_s6 = sand.u32 1, %s1918_s24   ;;  %s1300_s13 = sshll.u32 %s263_s29, 9 }
  0x76   : > { %s273_s3 = scalar_lea.sflag [#allocation7], %s272_s6  ;;  %s2071_s18 = scalar_lea.vmem [#allocation6], %s1300_s13 }
  0x77   : > { %1811 = dma.done.wait (%p2229_p5), %s273_s3, 8192  }
  0x78   : > { %1813 = vsyncadd (%p2229_p5), %s273_s3, 4294959104  ;;  %p2230_p11 = scmp.eq.s32.totalorder %s1918_s24, 0 }
  0x7a   : > { %1815 = dma.done.wait (%p2230_p11), [#allocation7], 1024   ;;  %p2231_p10 = pmov %p2230_p11 }
  0x7b   : > { %p1302_p3 = scmp.ne.s32.totalorder %s1836_s21, 0 }
  0x7c   : > { %1817 = vsyncadd (%p2231_p10), [#allocation7], 4294966272  ;;  %v1303_v0 = vld [vmem:[%s2204_s2] ss:$0 sm:$0xff] (!%p1302_p3) }
  0x7d   : > { %315 = sbr.rel (%p1302_p3) target bundleno = 132 (0x84), region = 56  ;;  %323 = vst [vmem:[#allocation2] sm:$0xff] (!%p1302_p3), %v1303_v0  ;;  %324 = vst [vmem:[#allocation2 + $0x8] sm:$0xff] (!%p1302_p3), %v1303_v0 }
  0x84 PF: > { %v1596_v1 = vld [vmem:[%s2071_s18 + $0x40] sm:$0xff]   ;;  %v1600_v5 = vld [vmem:[%s2071_s18 + $0x48] sm:$0xff]   ;;  %v1604_v9 = vld [vmem:[%s2071_s18 + $0x50] sm:$0xff]   ;;  %p1376_p6 = scmp.ne.s32.totalorder %s1836_s21, 1 }
  0x85   : > { %v1597_v2 = vld [vmem:[%s2071_s18 + $0xc0] sm:$0xff]   ;;  %1392 = vmatprep.subr.bf16.mxu0 %v1596_v1  ;;  %v1601_v6 = vld [vmem:[%s2071_s18 + $0xc8] sm:$0xff]   ;;  %v1605_v10 = vld [vmem:[%s2071_s18 + $0xd0] sm:$0xff]   ;;  %vm1855_vm0 = vmmov (!%p1376_p6), 0  }
  0x86   : > { %v1598_v3 = vld [vmem:[%s2071_s18] sm:$0xff]   ;;  %1414 = vmatprep.subr.bf16.mxu1 %v1597_v2  ;;  %v1602_v7 = vld [vmem:[%s2071_s18 + $0x8] sm:$0xff]   ;;  %v1606_v11 = vld [vmem:[%s2071_s18 + $0x10] sm:$0xff]  }
  0x87   : > { %v1599_v4 = vld [vmem:[%s2071_s18 + $0x80] sm:$0xff]   ;;  %1393 = vmatpush3.bf16.msra.mxu0 %v1598_v3  ;;  %v1603_v8 = vld [vmem:[%s2071_s18 + $0x88] sm:$0xff]   ;;  %v1607_v12 = vld [vmem:[%s2071_s18 + $0x90] sm:$0xff]  }
  0x88   : > { %1415 = vmatpush3.bf16.msra.mxu1 %v1599_v4  ;;  %1394 = vmatprep.subr.bf16.mxu0 %v1600_v5  ;;  %v1608_v13 = vld [vmem:[%s2071_s18 + $0x58] sm:$0xff]   ;;  %v1612_v17 = vld [vmem:[%s2071_s18 + $0x60] sm:$0xff]   ;;  %v1616_v21 = vld [vmem:[%s2071_s18 + $0x68] sm:$0xff]  }
  0x89   : > { %1416 = vmatprep.subr.bf16.mxu1 %v1601_v6  ;;  %v1609_v14 = vld [vmem:[%s2071_s18 + $0xd8] sm:$0xff]   ;;  %v1613_v18 = vld [vmem:[%s2071_s18 + $0xe0] sm:$0xff]   ;;  %v1617_v22 = vld [vmem:[%s2071_s18 + $0xe8] sm:$0xff]  }
  0x8a   : > { %v1610_v15 = vld [vmem:[%s2071_s18 + $0x18] sm:$0xff]   ;;  %v1614_v19 = vld [vmem:[%s2071_s18 + $0x20] sm:$0xff]   ;;  %v1618_v23 = vld [vmem:[%s2071_s18 + $0x28] sm:$0xff]  }
  0x8b   : > { %1395 = vmatpush3.bf16.msra.mxu0 %v1602_v7  ;;  %v1611_v16 = vld [vmem:[%s2071_s18 + $0x98] sm:$0xff]   ;;  %v1615_v20 = vld [vmem:[%s2071_s18 + $0xa0] sm:$0xff]   ;;  %v1619_v24 = vld [vmem:[%s2071_s18 + $0xa8] sm:$0xff]  }
  0x8c   : > { %1417 = vmatpush3.bf16.msra.mxu1 %v1603_v8  ;;  %1396 = vmatprep.subr.bf16.mxu0 %v1604_v9  ;;  %v1620_v25 = vld [vmem:[%s2071_s18 + $0x70] sm:$0xff]   ;;  %v1624_v29 = vld [vmem:[%s2071_s18 + $0x78] sm:$0xff]   ;;  %v327_v33 = vld [vmem:[%s2064_s8] sm:$0xff] }
  0x8d   : > { %1418 = vmatprep.subr.bf16.mxu1 %v1605_v10  ;;  %v1621_v26 = vld [vmem:[%s2071_s18 + $0xf0] sm:$0xff]   ;;  %v1625_v30 = vld [vmem:[%s2071_s18 + $0xf8] sm:$0xff]   ;;  %v331_v34 = vld [vmem:[%s2064_s8 + $0x20] sm:$0xff] }
  0x8e   : > { %v1622_v27 = vld [vmem:[%s2071_s18 + $0x30] sm:$0xff]   ;;  %v1626_v31 = vld [vmem:[%s2071_s18 + $0x38] sm:$0xff]   ;;  %v328_v35 = vld [vmem:[%s2064_s8 + $0x8] sm:$0xff]  ;;  %v1304_v36 = vcombine.low %v327_v33, %v331_v34  ;;  %v1305_v37 = vcombine.high %v327_v33, %v331_v34 }
  0x8f   : > { %1397 = vmatpush3.bf16.msra.mxu0 %v1606_v11  ;;  %v1623_v28 = vld [vmem:[%s2071_s18 + $0xb0] sm:$0xff]   ;;  %v1627_v32 = vld [vmem:[%s2071_s18 + $0xb8] sm:$0xff]   ;;  %v332_v38 = vld [vmem:[%s2064_s8 + $0x28] sm:$0xff] }
  0x90   : > { %1419 = vmatpush3.bf16.msra.mxu1 %v1607_v12  ;;  %1398 = vmatprep.subr.bf16.mxu0 %v1608_v13  ;;  %v1306_v39 = vcombine.low %v328_v35, %v332_v38  ;;  %v1307_v40 = vcombine.high %v328_v35, %v332_v38  ;;  %v1628_v41 = vld [vmem:[%s2071_s18 + $0x140] sm:$0xff]   ;;  %v1632_v45 = vld [vmem:[%s2071_s18 + $0x148] sm:$0xff]   ;;  %v1636_v49 = vld [vmem:[%s2071_s18 + $0x150] sm:$0xff]  }
  0x91   : > { %1420 = vmatprep.subr.bf16.mxu1 %v1609_v14  ;;  %919 = vmatprep.mubr.bf16.mxu0 %v1305_v37  ;;  %v1629_v42 = vld [vmem:[%s2071_s18 + $0x1c0] sm:$0xff]   ;;  %v1633_v46 = vld [vmem:[%s2071_s18 + $0x1c8] sm:$0xff]   ;;  %v1637_v50 = vld [vmem:[%s2071_s18 + $0x1d0] sm:$0xff]  }
  0x92   : > { %960 = vmatprep.mubr.bf16.mxu1 %v1307_v40  ;;  %v1630_v43 = vld [vmem:[%s2071_s18 + $0x100] sm:$0xff]   ;;  %v1634_v47 = vld [vmem:[%s2071_s18 + $0x108] sm:$0xff]   ;;  %v1638_v51 = vld [vmem:[%s2071_s18 + $0x110] sm:$0xff]  }
  0x93   : > { %1399 = vmatpush3.bf16.msra.mxu0 %v1610_v15  ;;  %v1631_v44 = vld [vmem:[%s2071_s18 + $0x180] sm:$0xff]   ;;  %v1635_v48 = vld [vmem:[%s2071_s18 + $0x188] sm:$0xff]   ;;  %v1639_v52 = vld [vmem:[%s2071_s18 + $0x190] sm:$0xff]  }
  0x94   : > { %1421 = vmatpush3.bf16.msra.mxu1 %v1611_v16  ;;  %1400 = vmatprep.subr.bf16.mxu0 %v1612_v17  ;;  %v1640_v53 = vld [vmem:[%s2071_s18 + $0x158] sm:$0xff]   ;;  %v1644_v57 = vld [vmem:[%s2071_s18 + $0x160] sm:$0xff]   ;;  %v1648_v61 = vld [vmem:[%s2071_s18 + $0x168] sm:$0xff]  }
  0x95   : > { %1422 = vmatprep.subr.bf16.mxu1 %v1613_v18  ;;  %v1641_v54 = vld [vmem:[%s2071_s18 + $0x1d8] sm:$0xff]   ;;  %v1645_v58 = vld [vmem:[%s2071_s18 + $0x1e0] sm:$0xff]   ;;  %v1649_v62 = vld [vmem:[%s2071_s18 + $0x1e8] sm:$0xff]  }
  0x96   : > { %v1642_v55 = vld [vmem:[%s2071_s18 + $0x118] sm:$0xff]   ;;  %v1646_v59 = vld [vmem:[%s2071_s18 + $0x120] sm:$0xff]   ;;  %v1650_v63 = vld [vmem:[%s2071_s18 + $0x128] sm:$0xff]  }
  0x97   : > { %1401 = vmatpush3.bf16.msra.mxu0 %v1614_v19  ;;  %v1643_v56 = vld [vmem:[%s2071_s18 + $0x198] sm:$0xff]   ;;  %v1647_v60 = vld [vmem:[%s2071_s18 + $0x1a0] sm:$0xff]   ;;  %v1651_v0 = vld [vmem:[%s2071_s18 + $0x1a8] sm:$0xff]  }
  0x98   : > { %1423 = vmatpush3.bf16.msra.mxu1 %v1615_v20  ;;  %1402 = vmatprep.subr.bf16.mxu0 %v1616_v21  ;;  %v1652_v1 = vld [vmem:[%s2071_s18 + $0x170] sm:$0xff]   ;;  %v1656_v5 = vld [vmem:[%s2071_s18 + $0x178] sm:$0xff]  }
  0x99   : > { %1424 = vmatprep.subr.bf16.mxu1 %v1617_v22  ;;  %v1653_v2 = vld [vmem:[%s2071_s18 + $0x1f0] sm:$0xff]   ;;  %v1657_v6 = vld [vmem:[%s2071_s18 + $0x1f8] sm:$0xff]  }
  0x9a   : > { %v1654_v3 = vld [vmem:[%s2071_s18 + $0x130] sm:$0xff]   ;;  %v1658_v7 = vld [vmem:[%s2071_s18 + $0x138] sm:$0xff]  }
  0x9b   : > { %1403 = vmatpush3.bf16.msra.mxu0 %v1618_v23  ;;  %v1655_v4 = vld [vmem:[%s2071_s18 + $0x1b0] sm:$0xff]   ;;  %v1659_v8 = vld [vmem:[%s2071_s18 + $0x1b8] sm:$0xff]  }
  0x9c   : > { %1425 = vmatpush3.bf16.msra.mxu1 %v1619_v24  ;;  %1404 = vmatprep.subr.bf16.mxu0 %v1620_v25  ;;  %v329_v9 = vld [vmem:[%s2064_s8 + $0x10] sm:$0xff]  ;;  %v330_v13 = vld [vmem:[%s2064_s8 + $0x18] sm:$0xff] }
  0x9d   : > { %1426 = vmatprep.subr.bf16.mxu1 %v1621_v26  ;;  %v333_v10 = vld [vmem:[%s2064_s8 + $0x30] sm:$0xff]  ;;  %v334_v14 = vld [vmem:[%s2064_s8 + $0x38] sm:$0xff] }
  0x9e   : > { %v1308_v11 = vcombine.low %v329_v9, %v333_v10  ;;  %v1309_v12 = vcombine.high %v329_v9, %v333_v10  ;;  %v1310_v15 = vcombine.low %v330_v13, %v334_v14  ;;  %v1311_v16 = vcombine.high %v330_v13, %v334_v14 }
  0x9f   : > { %1405 = vmatpush3.bf16.msra.mxu0 %v1622_v27 }
  0xa0   : > { %1427 = vmatpush3.bf16.msra.mxu1 %v1623_v28  ;;  %1406 = vmatprep.subr.bf16.mxu0 %v1624_v29 }
  0xa1   : > { %1428 = vmatprep.subr.bf16.mxu1 %v1625_v30 }
  0xa3   : > { %1407 = vmatpush3.bf16.msra.mxu0 %v1626_v31 }
  0xa4   : > { %1429 = vmatpush3.bf16.msra.mxu1 %v1627_v32  ;;  %1436 = vmatprep.subr.bf16.mxu0 %v1628_v41 }
  0xa5   : > { %1458 = vmatprep.subr.bf16.mxu1 %v1629_v42 }
  0xa6   : > { %920 = vmatmul.mubr.bf16.vlgmr.msra.gmra.mrb[0].mxu0 %v1304_v36 }
  0xa7   : > { %961 = vmatmul.mubr.bf16.vlgmr.msra.gmra.mrb[0].mxu1 %v1306_v39  ;;  %1437 = vmatpush3.bf16.msra.mxu0 %v1630_v43  ;;  %v325_v43 = vld [vmem:[#allocation2] sm:$0xff] }
  0xa8   : > { %1459 = vmatpush3.bf16.msra.mxu1 %v1631_v44  ;;  %1438 = vmatprep.subr.bf16.mxu0 %v1632_v45 }
  0xa9   : > { %1460 = vmatprep.subr.bf16.mxu1 %v1633_v46  ;;  %1001 = vmatprep.mubr.bf16.mxu0 %v1309_v12 }
  0xaa   : > { %1042 = vmatprep.mubr.bf16.mxu1 %v1311_v16 }
  0xab   : > { %1439 = vmatpush3.bf16.msra.mxu0 %v1634_v47  ;;  %v326_v47 = vld [vmem:[#allocation2 + $0x8] sm:$0xff] }
  0xac   : > { %1461 = vmatpush3.bf16.msra.mxu1 %v1635_v48  ;;  %1440 = vmatprep.subr.bf16.mxu0 %v1636_v49 }
  0xad   : > { %1462 = vmatprep.subr.bf16.mxu1 %v1637_v50 }
  0xaf   : > { %1441 = vmatpush3.bf16.msra.mxu0 %v1638_v51  ;;  %v1660_v51 = vld [vmem:[#allocation8] sm:$0xff] (!%p1376_p6)  }
  0xb0   : > { %1463 = vmatpush3.bf16.msra.mxu1 %v1639_v52  ;;  %1442 = vmatprep.subr.bf16.mxu0 %v1640_v53  ;;  %v1854_v52 = vmov (!%p1376_p6), 0.0   ;;  %v1661_v53 = vld [vmem:[#allocation8 + $0x8] sm:$0xff] (!%p1376_p6)  }
  0xb1   : > { %1464 = vmatprep.subr.bf16.mxu1 %v1641_v54  ;;  %v1662_v54 = vld [vmem:[#allocation8 + $0x10] sm:$0xff] (!%p1376_p6)  }
  0xb3   : > { %1443 = vmatpush3.bf16.msra.mxu0 %v1642_v55  ;;  %v1663_v55 = vld [vmem:[#allocation8 + $0x18] sm:$0xff] (!%p1376_p6)  }
  0xb4   : > { %1465 = vmatpush3.bf16.msra.mxu1 %v1643_v56  ;;  %1444 = vmatprep.subr.bf16.mxu0 %v1644_v57  ;;  %v1664_v56 = vld [vmem:[#allocation8 + $0x20] sm:$0xff] (!%p1376_p6)   ;;  %v1665_v57 = vld [vmem:[#allocation8 + $0x28] sm:$0xff] (!%p1376_p6)  }
  0xb5   : > { %1466 = vmatprep.subr.bf16.mxu1 %v1645_v58  ;;  %v1666_v58 = vld [vmem:[#allocation8 + $0x30] sm:$0xff] (!%p1376_p6)  }
  0xb7   : > { %1445 = vmatpush3.bf16.msra.mxu0 %v1646_v59 }
  0xb8   : > { %1467 = vmatpush3.bf16.msra.mxu1 %v1647_v60  ;;  %1446 = vmatprep.subr.bf16.mxu0 %v1648_v61 }
  0xb9   : > { %1468 = vmatprep.subr.bf16.mxu1 %v1649_v62 }
  0xbb   : > { %1447 = vmatpush3.bf16.msra.mxu0 %v1650_v63  ;;  %v1667_v63 = vld [vmem:[#allocation8 + $0x38] sm:$0xff] (!%p1376_p6)  }
  0xbc   : > { %1469 = vmatpush3.bf16.msra.mxu1 %v1651_v0  ;;  %1448 = vmatprep.subr.bf16.mxu0 %v1652_v1  ;;  %v1377_v1 = vld [vmem:[%s2206_s4] ss:$0 sm:$0xff] (!%p1376_p6) }
  0xbd   : > { %1470 = vmatprep.subr.bf16.mxu1 %v1653_v2 }
  0xbf   : > { %1449 = vmatpush3.bf16.msra.mxu0 %v1654_v3 }
  0xc0   : > { %1471 = vmatpush3.bf16.msra.mxu1 %v1655_v4  ;;  %1450 = vmatprep.subr.bf16.mxu0 %v1656_v5 }
  0xc1   : > { %1472 = vmatprep.subr.bf16.mxu1 %v1657_v6 }
  0xc3   : > { %1451 = vmatpush3.bf16.msra.mxu0 %v1658_v7 }
  0xc4   : > { %1473 = vmatpush3.bf16.msra.mxu1 %v1659_v8  ;;  %1489 = vmatprep.subr.bf16.mxu0 (!%p1376_p6), %v1854_v52 }
  0xc6   : > { %1002 = vmatmul.mubr.bf16.vlgmr.msra.gmra.mrb[4].mxu0 %v1308_v11 }
  0xc7   : > { %1043 = vmatmul.mubr.bf16.vlgmr.msra.gmra.mrb[4].mxu1 %v1310_v15  ;;  %1490 = vmatpush3.bf16.msra.mxu0 (!%p1376_p6), %v1660_v51 }
  0xc8   : > { %1505 = vmatprep.mubr.msk.bf16.mxu0 (!%p1376_p6), %vm1855_vm0, %v1854_v52  ;;  %1491 = vmatprep.subr.bf16.mxu0 (!%p1376_p6), %v1854_v52 }
  0xcb   : > { %1492 = vmatpush3.bf16.msra.mxu0 (!%p1376_p6), %v1661_v53 }
  0xcc   : > { %1493 = vmatprep.subr.bf16.mxu0 (!%p1376_p6), %v1854_v52 }
  0xcf   : > { %1494 = vmatpush3.bf16.msra.mxu0 (!%p1376_p6), %v1662_v54 }
  0xd0   : > { %1495 = vmatprep.subr.bf16.mxu0 (!%p1376_p6), %v1854_v52 }
  0xd3   : > { %1496 = vmatpush3.bf16.msra.mxu0 (!%p1376_p6), %v1663_v55 }
  0xd4   : > { %1497 = vmatprep.subr.bf16.mxu0 (!%p1376_p6), %v1854_v52 }
  0xd7   : > { %1498 = vmatpush3.bf16.msra.mxu0 (!%p1376_p6), %v1664_v56 }
  0xd8   : > { %1499 = vmatprep.subr.bf16.mxu0 (!%p1376_p6), %v1854_v52 }
  0xdb   : > { %1500 = vmatpush3.bf16.msra.mxu0 (!%p1376_p6), %v1665_v57 }
  0xdc   : > { %1501 = vmatprep.subr.bf16.mxu0 (!%p1376_p6), %v1854_v52 }
  0xdf   : > { %1502 = vmatpush3.bf16.msra.mxu0 (!%p1376_p6), %v1666_v58 }
  0xe0   : > { %1503 = vmatprep.subr.bf16.mxu0 (!%p1376_p6), %v1854_v52 }
  0xe3   : > { %1504 = vmatpush3.bf16.msra.mxu0 (!%p1376_p6), %v1667_v63 }
 0x179   : > { %v1408_v17 = vpop.f32.mrb[0].mxu0 }
 0x17a   : > { %v1430_v18 = vpop.f32.mrb[0].mxu1  ;;  %v1409_v19 = vpop.f32.mrb[1].mxu0 }
 0x17b   : > { %v1410_v20 = vadd.f32 %v1409_v19, %v1408_v17  ;;  %v1431_v21 = vpop.f32.mrb[1].mxu1  ;;  %v1411_v22 = vpop.f32.mrb[2].mxu0 }
 0x17c   : > { %v1432_v23 = vadd.f32 %v1431_v21, %v1430_v18  ;;  %v1433_v24 = vpop.f32.mrb[2].mxu1  ;;  %v1412_v25 = vpop.f32.mrb[3].mxu0 }
 0x17d   : > { %v1413_v26 = vadd.f32 %v1412_v25, %v1411_v22  ;;  %v1434_v27 = vpop.f32.mrb[3].mxu1 }
 0x17e   : > { %v963_v28 = vadd.f32 %v1432_v23, %v1410_v20  ;;  %v1435_v29 = vadd.f32 %v1434_v27, %v1433_v24 }
 0x180   : > { %v966_v30 = vadd.f32 %v1435_v29, %v1413_v26 }
 0x199   : > { %v1452_v31 = vpop.f32.mrb[4].mxu0 }
 0x19a   : > { %v1474_v32 = vpop.f32.mrb[4].mxu1  ;;  %v1453_v33 = vpop.f32.mrb[5].mxu0 }
 0x19b   : > { %v1454_v34 = vadd.f32 %v1453_v33, %v1452_v31  ;;  %v1475_v35 = vpop.f32.mrb[5].mxu1  ;;  %v1455_v36 = vpop.f32.mrb[6].mxu0 }
 0x19c   : > { %v1476_v37 = vadd.f32 %v1475_v35, %v1474_v32  ;;  %v1477_v38 = vpop.f32.mrb[6].mxu1  ;;  %v1456_v39 = vpop.f32.mrb[7].mxu0 }
 0x19d   : > { %v1004_v40 = vadd.f32 %v1454_v34, %v963_v28  ;;  %v1457_v41 = vadd.f32 %v1456_v39, %v1455_v36  ;;  %v1478_v42 = vpop.f32.mrb[7].mxu1 }
 0x19e   : > { %v1479_v44 = vadd.f32 %v1478_v42, %v1477_v38 }
 0x19f   : > { %v1045_v45 = vadd.f32 %v1476_v37, %v1004_v40  ;;  %v1007_v46 = vadd.f32 %v1457_v41, %v966_v30  ;;  %1058 = sbr.rel (%p1376_p6) target bundleno = 652 (0x28c), region = 60 }
 0x1a1   : > { %v1051_v48 = vadd.f32 %v1045_v45, %v325_v43  ;;  %v1048_v49 = vadd.f32 %v1479_v44, %v1007_v46 }
 0x1a3   : > { %1053 = vst [vmem:[#allocation2] sm:$0xff] %v1051_v48  ;;  %v1052_v50 = vadd.f32 %v1048_v49, %v326_v47 }
 0x1a5   : > { %1054 = vst [vmem:[#allocation2 + $0x8] sm:$0xff] %v1052_v50 }
 0x1aa   : > { %v1059_v59 = vld [vmem:[#allocation2] sm:$0xff] }
 0x1ab   : > { %v1061_v61 = vmax.f32 %v1059_v59, 0.0 }
 0x1ac   : > { %v1060_v60 = vld [vmem:[#allocation2 + $0x8] sm:$0xff] }
 0x1ad   : > { %v1062_v62 = vmax.f32 %v1060_v60, 0.0 }
 0x1af   : > { %v1063_v0 = vpack.c.bf16 %v1062_v62, %v1061_v61 }
 0x1b1   : > { %1506 = vmatmul.mubr.bf16.vlgmr.msra.gmra.mrb[0].mxu0 %v1063_v0 }
 0x284   : > { %v1169_v2 = vpop.f32.mrb[0].mxu0 }
 0x285   : > { %v1170_v3 = vadd.f32 %v1377_v1, %v1169_v2  ;;  %v1507_v4 = vpop.f32.mrb[1].mxu0 }
 0x286   : > { %v1172_v5 = vpop.f32.mrb[2].mxu0 }
 0x287   : > { %v1176_v6 = vmax.f32 %v1170_v3, 0.0  ;;  %v1173_v7 = vadd.f32 %v1377_v1, %v1172_v5  ;;  %v1508_v8 = vpop.f32.mrb[3].mxu0 }
 0x289   : > { %1178 = vst [vmem:[#allocation9] sm:$0xff] %v1176_v6  ;;  %v1177_v9 = vmax.f32 %v1173_v7, 0.0 }
 0x28b   : > { %1179 = vst [vmem:[#allocation9 + $0x8] sm:$0xff] %v1177_v9 }
 0x28c PF: > { %p1535_p8 = scmp.eq.s32.totalorder %s1918_s24, 1  ;;  %s1856_s14 = smov [#allocation9]  }
 0x28d   : > { %s1189_s28 = sshll.u32 %s1856_s14, 4  ;;  %s1190_s28 = int_to_ptr.vmem [resolvable:$true] %s1189_s28 }
 0x28e   : > { %s1756_s16 = scalar_lea.vmem %s1190_s28, 256  ;;  %p1763_p0 = scmp.lt.s32.totalorder %s1190_s28, %s1190_s28 }
 0x28f   : > { %p1757_p13 = scmp.ne.s32.totalorder %s1190_s28, %s1756_s16  ;;  %p1764_p4 = scmp.lt.s32.totalorder %s1756_s16, %s1756_s16 }
 0x291   : > { %p1758_p1 = pnand %p1757_p13, %p1535_p8  ;;  %p1765_p7 = por %p1764_p4, %p1763_p0 }
 0x293   : > { %p1759_p2 = pneg %p1758_p1 }
 0x295   : > { %p1766_p9 = pnand %p1765_p7, %p1759_p2 }
 0x297   : > { %1769 = shalt.err (!%p1766_p9)
}
 0x298   : > { %s1770_s10 = scalar_lea.hbm %s2207_s5, 256 }
 0x299   : > { %p1771_p12 = scmp.ne.s32.totalorder %s2207_s5, %s1770_s10  ;;  %p1776_p10 = scmp.lt.u32.totalorder %s1770_s10, %s2207_s5 }
 0x29b   : > { %p1772_p5 = pnand %p1771_p12, %p1535_p8 }
 0x29d   : > { %p1773_p11 = pneg %p1772_p5 }
 0x29f   : > { %p1778_p3 = pnand %p1776_p10, %p1773_p11 }
 0x2a1   : > { %1781 = shalt.err (!%p1778_p3)
}
 0x2a2   : > { %s1857_s25 = smov 128   ;;  %s1858_s9 = smov 8  }
 0x2a3   : > { %1518 = dma.vmem_to_hbm [thread:$0]  (%p1535_p8), %s1190_s28, 256, %s2207_s5, [#allocation5], %s1857_s25, %s1857_s25, %s1858_s9  }
 0x2a4   : > { %1819 = dma.done.wait (%p1535_p8), [#allocation5], 256  }
 0x2a5   : > { %1821 = vsyncadd (%p1535_p8), [#allocation5], 4294967040 }
 0x2a6 PF: > { %s22_s23 = sadd.s32 1, %s1844_s23   ;;  %s2232_s13 = sld [smem:[#allocation14_spill]] }
 0x2a7   : > { %p19_p6 = scmp.ge.s32.totalorder %s22_s23, 4   ;;  %s2233_s18 = smov %s1828_s19 }
 0x2a8   : > { %s2234_s19 = smov %s1832_s20  ;;  %s2235_s20 = smov %s1988_s15 }
 0x2a9   : > { %s2236_s21 = smov %s1840_s22  ;;  %21 = sbr.rel (!%p19_p6) target bundleno = 10 (0xa), region = 103 }
 0x2ac   : > { %s2237_s22 = smov %s2232_s13 }
 0x2b0   :  { %1205 = vsyncpa [#allocation4], 1 }
 0x2b1   :  { %1207 = vsyncpa [#allocation4 + $0x1], 1 }
 0x2b2   :  { %1208 = vsyncpa [#allocation7], 1 }
 0x2b3   :  { %1210 = vsyncpa [#allocation7 + $0x1], 1 }
 0x2b4   :  { %1211 = vsyncpa [#allocation5], 1 }
 0x2b5   :  { %1213 = vsyncpa [#allocation5 + $0x1], 1 }

</bundles_post_ra>
